<compile_context>
chip_gen: v7x
topology: tpu7x:2x2x1
jax: 0.10.0
libtpu: 0.0.40
codegen_flags: <defaults>
</compile_context>

<pallas_src>
import functools

import jax
import jax.numpy as jnp
from jax import lax
from jax.experimental import pallas as pl
from jax.experimental.pallas import tpu as pltpu


# --------------------------------------------------------------------------
# Kernel
# --------------------------------------------------------------------------
def _fused_basic_block_kernel(x_ref, b1_ref, b2_ref, bias1_ref, bias2_ref,
                              o_ref, *, height):
    """relu(bn2(conv2(relu(bn1(conv1(x))))) + x) for a block of batch items.

    Rows are (batch, h) flattened sample-major; columns are the lane-dense
    (W * C) axis.

    x_ref:     (bn*H, W*Cin)        input rows (compute dtype: f32 or bf16)
    b1_ref:    (3, W*Cin, W*Cout)   banded conv1 weights, BN1 scale folded in
    b2_ref:    (3, W*Cout, W*Cout)  banded conv2 weights, BN2 scale folded in
    bias1_ref: (1, W*Cout)          folded BN1 bias (f32)
    bias2_ref: (1, W*Cout)          folded BN2 bias (f32)
    o_ref:     (bn*H, W*Cout)       output rows (f32)
    """
    m = x_ref.shape[0]
    cdt = x_ref.dtype

    # Per-row "which image row am I" masks.  Blocks start at sample
    # boundaries, so r % H is the in-image row.  Computed once, reused by
    # both conv stages (no per-stage broadcast re-materialisation).
    h_idx = lax.broadcasted_iota(jnp.int32, (m, 1), 0) % height
    not_first = h_idx != 0              # a row above exists (same sample)
    not_last = h_idx != height - 1      # a row below exists (same sample)

    x = x_ref[...]                      # (m, W*Cin), compute dtype

    def conv3x3(inp, w_ref):
        """Padded 3x3 conv as 3 banded MXU matmuls over all block rows."""
        zrow = jnp.zeros((1, inp.shape[1]), inp.dtype)
        up = jnp.concatenate([zrow, inp[:-1]], axis=0)     # row h-1 (ky = 0)
        dn = jnp.concatenate([inp[1:], zrow], axis=0)      # row h+1 (ky = 2)
        # Kill contributions that would leak across sample boundaries
        # (this also implements the vertical zero padding of the conv).
        up = jnp.where(not_first, up, jnp.zeros_like(up))
        dn = jnp.where(not_last, dn, jnp.zeros_like(dn))
        acc = jnp.dot(up, w_ref[0], preferred_element_type=jnp.float32)
        acc += jnp.dot(inp, w_ref[1], preferred_element_type=jnp.float32)
        acc += jnp.dot(dn, w_ref[2], preferred_element_type=jnp.float32)
        return acc                                          # (m, W*Cout) f32

    # ---- stage 1: conv1 (+ folded BN1 scale) -> + bias -> ReLU -------------
    out1 = jnp.maximum(conv3x3(x, b1_ref) + bias1_ref[...], 0.0)  # stays in VMEM
    # ---- stage 2: conv2 (+ folded BN2 scale) -> + bias -> + identity -> ReLU
    out2 = conv3x3(out1.astype(cdt), b2_ref) + bias2_ref[...]
    out2 = jnp.maximum(out2 + x.astype(jnp.float32), 0.0)
    o_ref[...] = out2.astype(o_ref.dtype)                   # 128-lane-dense store


# --------------------------------------------------------------------------
# Wrapper-side weight preparation
# --------------------------------------------------------------------------
def _fold_bn(gamma, beta, mean, var, eps=1e-5):
    scale = gamma / jnp.sqrt(var + eps)
    return scale, beta - mean * scale


def _banded_conv3x3_weight(w_hwio, width):
    """Expand (3,3,Cin,Cout) HWIO weights into 3 banded (W*Cin, W*Cout) mats.

    With image rows flattened w-major / channel-minor, the horizontal taps +
    channel contraction of a padded 3x3 conv become one dense matmul per
    vertical tap:  out_row[h] = sum_ky row[h + ky - 1] @ B[ky]
    (rows outside the image are zero; out-of-range horizontal taps simply
    have no band entry, which is exactly zero padding).
    """
    _, _, cin, cout = w_hwio.shape
    mats = []
    for ky in range(3):
        bk = jnp.zeros((width, cin, width, cout), w_hwio.dtype)
        for kx in range(3):
            dx = kx - 1
            lo, hi = max(0, -dx), min(width, width - dx)
            ws = jnp.arange(lo, hi)                          # valid output columns
            bk = bk.at[ws + dx, :, ws, :].set(w_hwio[ky, kx])
        mats.append(bk.reshape(width * cin, width * cout))
    return jnp.stack(mats, axis=0)                           # (3, W*Cin, W*Cout)


def _pick_batch_block(n, h):
    """Smallest batch block giving >=128 matmul rows with legal (8, .) tiling."""
    for bn in range(1, n + 1):
        if n % bn:
            continue
        if bn * h >= 128 and (bn == n or (bn * h) % 8 == 0):
            return bn
    return n   # single block (block dims == full dims is always legal)


# --------------------------------------------------------------------------
# Forward
# --------------------------------------------------------------------------
def basic_block_forward(x_nchw, params, *, compute_dtype=jnp.float32, eps=1e-5):
    """BasicBlock.forward (stride=1, downsample=None, eval-mode BN) on TPU."""
    N, cin, H, W = x_nchw.shape
    cout = params["w1"].shape[0]
    assert params["w1"].shape[1] == cin and cout == cin, (
        "identity residual requires inplanes == planes (no downsample path)")

    # NCHW -> NHWC -> (N*H, W*C): channels fastest (W on the lane axis),
    # (batch, h) flattened onto the sublane/matmul-M axis.
    x = jnp.transpose(x_nchw, (0, 2, 3, 1)).reshape(N * H, W * cin)
    x = x.astype(compute_dtype)

    # Fold BN scale into the conv weights; only a bias add remains in-kernel.
    s1, bias1 = _fold_bn(params["bn1_gamma"], params["bn1_beta"],
                         params["bn1_mean"], params["bn1_var"], eps)
    s2, bias2 = _fold_bn(params["bn2_gamma"], params["bn2_beta"],
                         params["bn2_mean"], params["bn2_var"], eps)
    w1 = jnp.transpose(params["w1"], (2, 3, 1, 0)) * s1      # OIHW -> HWIO, scaled
    w2 = jnp.transpose(params["w2"], (2, 3, 1, 0)) * s2

    b1 = _banded_conv3x3_weight(w1, W).astype(compute_dtype)  # (3, W*cin,  W*cout)
    b2 = _banded_conv3x3_weight(w2, W).astype(compute_dtype)  # (3, W*cout, W*cout)
    bias1_row = jnp.tile(bias1, W).reshape(1, W * cout).astype(jnp.float32)
    bias2_row = jnp.tile(bias2, W).reshape(1, W * cout).astype(jnp.float32)

    wcin, wcout = W * cin, W * cout
    bn = _pick_batch_block(N, H)
    rows = bn * H

    kernel = functools.partial(_fused_basic_block_kernel, height=H)
    out = pl.pallas_call(
        kernel,
        out_shape=jax.ShapeDtypeStruct((N * H, wcout), jnp.float32),
        grid_spec=pltpu.PrefetchScalarGridSpec(
            num_scalar_prefetch=0,
            grid=(N // bn,),                              # pipelined, megacore-parallel
            in_specs=[
                pl.BlockSpec((rows, wcin), lambda b: (b, 0)),
                pl.BlockSpec((3, wcin, wcout), lambda b: (0, 0, 0)),   # grid-invariant
                pl.BlockSpec((3, wcout, wcout), lambda b: (0, 0, 0)),  # grid-invariant
                pl.BlockSpec((1, wcout), lambda b: (0, 0)),
                pl.BlockSpec((1, wcout), lambda b: (0, 0)),
            ],
            out_specs=pl.BlockSpec((rows, wcout), lambda b: (b, 0)),
        ),
        compiler_params=pltpu.CompilerParams(
            dimension_semantics=("parallel",),
            vmem_limit_bytes=32 * 1024 * 1024,
        ),
    )(x, b1, b2, bias1_row, bias2_row)

    # (N*H, W*cout) -> NHWC -> NCHW
    return jnp.transpose(out.reshape(N, H, W, cout), (0, 3, 1, 2))


# --------------------------------------------------------------------------
# Pure-JAX reference (PyTorch eval-mode semantics) and test harness
# --------------------------------------------------------------------------
def _reference_forward(x_nchw, params, eps=1e-5):
    def conv(x, w):
        return lax.conv_general_dilated(
            x, w, window_strides=(1, 1), padding=((1, 1), (1, 1)),
            dimension_numbers=("NCHW", "OIHW", "NCHW"))

    def bn(x, g, b, m, v):
        g, b, m, v = (a.reshape(1, -1, 1, 1) for a in (g, b, m, v))
        return (x - m) / jnp.sqrt(v + eps) * g + b

    out = conv(x_nchw, params["w1"])
    out = bn(out, params["bn1_gamma"], params["bn1_beta"],
             params["bn1_mean"], params["bn1_var"])
    out = jnp.maximum(out, 0.0)
    out = conv(out, params["w2"])
    out = bn(out, params["bn2_gamma"], params["bn2_beta"],
             params["bn2_mean"], params["bn2_var"])
    out = out + x_nchw
    return jnp.maximum(out, 0.0)


def make_params(key, inplanes, planes):
    ks = jax.random.split(key, 6)
    return {
        "w1": 0.1 * jax.random.normal(ks[0], (planes, inplanes, 3, 3), jnp.float32),
        "w2": 0.1 * jax.random.normal(ks[1], (planes, planes, 3, 3), jnp.float32),
        "bn1_gamma": 1.0 + 0.1 * jax.random.normal(ks[2], (planes,), jnp.float32),
        "bn1_beta": 0.1 * jax.random.normal(ks[3], (planes,), jnp.float32),
        "bn1_mean": jnp.zeros((planes,), jnp.float32),
        "bn1_var": jnp.ones((planes,), jnp.float32),
        "bn2_gamma": 1.0 + 0.1 * jax.random.normal(ks[4], (planes,), jnp.float32),
        "bn2_beta": 0.1 * jax.random.normal(ks[5], (planes,), jnp.float32),
        "bn2_mean": jnp.zeros((planes,), jnp.float32),
        "bn2_var": jnp.ones((planes,), jnp.float32),
    }


if __name__ == "__main__":
    N, C, H, W = 2, 8, 16, 16          # W*C == 128: fully lane-dense layout
    key = jax.random.PRNGKey(0)
    kx_key, kp_key = jax.random.split(key)
    x = jax.random.normal(kx_key, (N, C, H, W), jnp.float32)
    params = make_params(kp_key, inplanes=C, planes=C)

    ref = jax.block_until_ready(_reference_forward(x, params))

    # f32 path: exact-semantics check.
    out = jax.block_until_ready(basic_block_forward(x, params))
    assert out.shape == (N, C, H, W), out.shape
    assert jnp.allclose(out, ref, atol=1e-4, rtol=1e-4), float(
        jnp.max(jnp.abs(out - ref)))

    # bf16-operand fast path (v6e/v7x): f32 accumulation/epilogue, loose check.
    out_bf16 = jax.block_until_ready(
        basic_block_forward(x, params, compute_dtype=jnp.bfloat16))
    assert float(jnp.max(jnp.abs(out_bf16 - ref))) < 0.25

    print("KERNEL_OK")
</pallas_src>

<mosaic_0001>
module attributes {stable_mosaic.version = 11 : i64} {
  func.func @_fused_basic_block_kernel(%arg0: i32, %arg1: memref<32x128xf32, #tpu.memory_space<vmem>>, %arg2: memref<3x128x128xf32, #tpu.memory_space<vmem>>, %arg3: memref<3x128x128xf32, #tpu.memory_space<vmem>>, %arg4: memref<1x128xf32, #tpu.memory_space<vmem>>, %arg5: memref<1x128xf32, #tpu.memory_space<vmem>>, %arg6: memref<32x128xf32, #tpu.memory_space<vmem>>) attributes {dimension_semantics = [#tpu.dimension_semantics<parallel>], iteration_bounds = array<i64: 1>, scalar_prefetch = 0 : i64, scratch_operands = 0 : i64, tpu.core_type = #tpu.core_type<tc>, window_params = [{transform_indices = @transform_0, window_bounds = array<i64: 32, 128>}, {pipeline_mode = #tpu.pipeline_mode<synchronous>, transform_indices = @transform_1, window_bounds = array<i64: 3, 128, 128>}, {pipeline_mode = #tpu.pipeline_mode<synchronous>, transform_indices = @transform_2, window_bounds = array<i64: 3, 128, 128>}, {pipeline_mode = #tpu.pipeline_mode<synchronous>, transform_indices = @transform_3, window_bounds = array<i64: 1, 128>}, {pipeline_mode = #tpu.pipeline_mode<synchronous>, transform_indices = @transform_4, window_bounds = array<i64: 1, 128>}, {transform_indices = @transform_5, window_bounds = array<i64: 32, 128>}]} {
    %0 = tpu.iota {dimensions = array<i32: 0>} : vector<32x1xi32>
    %c16_i32 = arith.constant 16 : i32
    %c0_i32 = arith.constant 0 : i32
    %1 = arith.cmpi eq, %c16_i32, %c0_i32 : i32
    %c1_i32 = arith.constant 1 : i32
    %2 = arith.select %1, %c1_i32, %c16_i32 : i32
    %3 = vector.broadcast %2 : i32 to vector<32x1xi32>
    %4 = arith.remsi %0, %3 : vector<32x1xi32>
    %c0_i32_0 = arith.constant 0 : i32
    %5 = vector.broadcast %c0_i32_0 : i32 to vector<32x1xi32>
    %6 = arith.cmpi ne, %4, %5 : vector<32x1xi32>
    %c0_i32_1 = arith.constant 0 : i32
    %7 = vector.broadcast %c0_i32_1 : i32 to vector<32x1xi32>
    %8 = arith.cmpi slt, %4, %7 : vector<32x1xi32>
    %c0_i32_2 = arith.constant 0 : i32
    %9 = arith.cmpi slt, %2, %c0_i32_2 : i32
    %10 = vector.broadcast %9 : i1 to vector<32x1xi1>
    %11 = vector.broadcast %10 : vector<32x1xi1> to vector<32x1xi1>
    %12 = arith.xori %8, %11 : vector<32x1xi1>
    %13 = arith.andi %12, %6 : vector<32x1xi1>
    %14 = vector.broadcast %2 : i32 to vector<32x1xi32>
    %15 = arith.addi %4, %14 : vector<32x1xi32>
    %16 = arith.select %13, %15, %4 : vector<32x1xi1>, vector<32x1xi32>
    %c0_i32_3 = arith.constant 0 : i32
    %17 = vector.broadcast %c0_i32_3 : i32 to vector<32x1xi32>
    %18 = arith.cmpi ne, %16, %17 : vector<32x1xi32>
    %c15_i32 = arith.constant 15 : i32
    %19 = vector.broadcast %c15_i32 : i32 to vector<32x1xi32>
    %20 = arith.cmpi ne, %16, %19 : vector<32x1xi32>
    %c0 = arith.constant 0 : index
    %c0_4 = arith.constant 0 : index
    %21 = vector.load %arg1[%c0, %c0_4] : memref<32x128xf32, #tpu.memory_space<vmem>>, vector<32x128xf32>
    %cst = arith.constant 0.000000e+00 : f32
    %22 = vector.broadcast %cst : f32 to vector<1x128xf32>
    %23 = vector.extract_strided_slice %21 {offsets = [0, 0], sizes = [31, 128], strides = [1, 1]} : vector<32x128xf32> to vector<31x128xf32>
    %24 = tpu.concatenate %22, %23 in 0 : vector<1x128xf32>, vector<31x128xf32> -> vector<32x128xf32>
    %25 = vector.extract_strided_slice %21 {offsets = [1, 0], sizes = [31, 128], strides = [1, 1]} : vector<32x128xf32> to vector<31x128xf32>
    %26 = tpu.concatenate %25, %22 in 0 : vector<31x128xf32>, vector<1x128xf32> -> vector<32x128xf32>
    %cst_5 = arith.constant 0.000000e+00 : f32
    %27 = vector.broadcast %cst_5 : f32 to vector<32x128xf32>
    %28 = vector.shape_cast %18 : vector<32x1xi1> to vector<32x1xi1>
    %29 = vector.broadcast %28 : vector<32x1xi1> to vector<32x128xi1>
    %30 = arith.select %29, %24, %27 : vector<32x128xi1>, vector<32x128xf32>
    %cst_6 = arith.constant 0.000000e+00 : f32
    %31 = vector.broadcast %cst_6 : f32 to vector<32x128xf32>
    %32 = vector.shape_cast %20 : vector<32x1xi1> to vector<32x1xi1>
    %33 = vector.broadcast %32 : vector<32x1xi1> to vector<32x128xi1>
    %34 = arith.select %33, %26, %31 : vector<32x128xi1>, vector<32x128xf32>
    %c0_7 = arith.constant 0 : index
    %c0_8 = arith.constant 0 : index
    %c0_9 = arith.constant 0 : index
    %35 = vector.load %arg2[%c0_7, %c0_8, %c0_9] : memref<3x128x128xf32, #tpu.memory_space<vmem>>, vector<1x128x128xf32>
    %36 = vector.shape_cast %35 : vector<1x128x128xf32> to vector<128x128xf32>
    %cst_10 = arith.constant dense<0.000000e+00> : vector<32x128xf32>
    %37 = tpu.matmul %30, %36, %cst_10 {dimension_numbers = #tpu.dot_dimension_numbers<[1], [0], [0], [1], [0, 0, 1, 1], [], []>} : vector<32x128xf32>, vector<128x128xf32>, vector<32x128xf32> -> vector<32x128xf32>
    %c1 = arith.constant 1 : index
    %c0_11 = arith.constant 0 : index
    %c0_12 = arith.constant 0 : index
    %38 = vector.load %arg2[%c1, %c0_11, %c0_12] : memref<3x128x128xf32, #tpu.memory_space<vmem>>, vector<1x128x128xf32>
    %39 = vector.shape_cast %38 : vector<1x128x128xf32> to vector<128x128xf32>
    %cst_13 = arith.constant dense<0.000000e+00> : vector<32x128xf32>
    %40 = tpu.matmul %21, %39, %cst_13 {dimension_numbers = #tpu.dot_dimension_numbers<[1], [0], [0], [1], [0, 0, 1, 1], [], []>} : vector<32x128xf32>, vector<128x128xf32>, vector<32x128xf32> -> vector<32x128xf32>
    %41 = arith.addf %37, %40 : vector<32x128xf32>
    %c2 = arith.constant 2 : index
    %c0_14 = arith.constant 0 : index
    %c0_15 = arith.constant 0 : index
    %42 = vector.load %arg2[%c2, %c0_14, %c0_15] : memref<3x128x128xf32, #tpu.memory_space<vmem>>, vector<1x128x128xf32>
    %43 = vector.shape_cast %42 : vector<1x128x128xf32> to vector<128x128xf32>
    %cst_16 = arith.constant dense<0.000000e+00> : vector<32x128xf32>
    %44 = tpu.matmul %34, %43, %cst_16 {dimension_numbers = #tpu.dot_dimension_numbers<[1], [0], [0], [1], [0, 0, 1, 1], [], []>} : vector<32x128xf32>, vector<128x128xf32>, vector<32x128xf32> -> vector<32x128xf32>
    %45 = arith.addf %41, %44 : vector<32x128xf32>
    %c0_17 = arith.constant 0 : index
    %c0_18 = arith.constant 0 : index
    %46 = vector.load %arg4[%c0_17, %c0_18] : memref<1x128xf32, #tpu.memory_space<vmem>>, vector<1x128xf32>
    %47 = vector.broadcast %46 : vector<1x128xf32> to vector<32x128xf32>
    %48 = arith.addf %45, %47 : vector<32x128xf32>
    %cst_19 = arith.constant 0.000000e+00 : f32
    %49 = vector.broadcast %cst_19 : f32 to vector<32x128xf32>
    %50 = arith.maximumf %48, %49 : vector<32x128xf32>
    %cst_20 = arith.constant 0.000000e+00 : f32
    %51 = vector.broadcast %cst_20 : f32 to vector<1x128xf32>
    %52 = vector.extract_strided_slice %50 {offsets = [0, 0], sizes = [31, 128], strides = [1, 1]} : vector<32x128xf32> to vector<31x128xf32>
    %53 = tpu.concatenate %51, %52 in 0 : vector<1x128xf32>, vector<31x128xf32> -> vector<32x128xf32>
    %54 = vector.extract_strided_slice %50 {offsets = [1, 0], sizes = [31, 128], strides = [1, 1]} : vector<32x128xf32> to vector<31x128xf32>
    %55 = tpu.concatenate %54, %51 in 0 : vector<31x128xf32>, vector<1x128xf32> -> vector<32x128xf32>
    %cst_21 = arith.constant 0.000000e+00 : f32
    %56 = vector.broadcast %cst_21 : f32 to vector<32x128xf32>
    %57 = vector.shape_cast %18 : vector<32x1xi1> to vector<32x1xi1>
    %58 = vector.broadcast %57 : vector<32x1xi1> to vector<32x128xi1>
    %59 = arith.select %58, %53, %56 : vector<32x128xi1>, vector<32x128xf32>
    %cst_22 = arith.constant 0.000000e+00 : f32
    %60 = vector.broadcast %cst_22 : f32 to vector<32x128xf32>
    %61 = vector.shape_cast %20 : vector<32x1xi1> to vector<32x1xi1>
    %62 = vector.broadcast %61 : vector<32x1xi1> to vector<32x128xi1>
    %63 = arith.select %62, %55, %60 : vector<32x128xi1>, vector<32x128xf32>
    %c0_23 = arith.constant 0 : index
    %c0_24 = arith.constant 0 : index
    %c0_25 = arith.constant 0 : index
    %64 = vector.load %arg3[%c0_23, %c0_24, %c0_25] : memref<3x128x128xf32, #tpu.memory_space<vmem>>, vector<1x128x128xf32>
    %65 = vector.shape_cast %64 : vector<1x128x128xf32> to vector<128x128xf32>
    %cst_26 = arith.constant dense<0.000000e+00> : vector<32x128xf32>
    %66 = tpu.matmul %59, %65, %cst_26 {dimension_numbers = #tpu.dot_dimension_numbers<[1], [0], [0], [1], [0, 0, 1, 1], [], []>} : vector<32x128xf32>, vector<128x128xf32>, vector<32x128xf32> -> vector<32x128xf32>
    %c1_27 = arith.constant 1 : index
    %c0_28 = arith.constant 0 : index
    %c0_29 = arith.constant 0 : index
    %67 = vector.load %arg3[%c1_27, %c0_28, %c0_29] : memref<3x128x128xf32, #tpu.memory_space<vmem>>, vector<1x128x128xf32>
    %68 = vector.shape_cast %67 : vector<1x128x128xf32> to vector<128x128xf32>
    %cst_30 = arith.constant dense<0.000000e+00> : vector<32x128xf32>
    %69 = tpu.matmul %50, %68, %cst_30 {dimension_numbers = #tpu.dot_dimension_numbers<[1], [0], [0], [1], [0, 0, 1, 1], [], []>} : vector<32x128xf32>, vector<128x128xf32>, vector<32x128xf32> -> vector<32x128xf32>
    %70 = arith.addf %66, %69 : vector<32x128xf32>
    %c2_31 = arith.constant 2 : index
    %c0_32 = arith.constant 0 : index
    %c0_33 = arith.constant 0 : index
    %71 = vector.load %arg3[%c2_31, %c0_32, %c0_33] : memref<3x128x128xf32, #tpu.memory_space<vmem>>, vector<1x128x128xf32>
    %72 = vector.shape_cast %71 : vector<1x128x128xf32> to vector<128x128xf32>
    %cst_34 = arith.constant dense<0.000000e+00> : vector<32x128xf32>
    %73 = tpu.matmul %63, %72, %cst_34 {dimension_numbers = #tpu.dot_dimension_numbers<[1], [0], [0], [1], [0, 0, 1, 1], [], []>} : vector<32x128xf32>, vector<128x128xf32>, vector<32x128xf32> -> vector<32x128xf32>
    %74 = arith.addf %70, %73 : vector<32x128xf32>
    %c0_35 = arith.constant 0 : index
    %c0_36 = arith.constant 0 : index
    %75 = vector.load %arg5[%c0_35, %c0_36] : memref<1x128xf32, #tpu.memory_space<vmem>>, vector<1x128xf32>
    %76 = vector.broadcast %75 : vector<1x128xf32> to vector<32x128xf32>
    %77 = arith.addf %74, %76 : vector<32x128xf32>
    %78 = arith.addf %77, %21 : vector<32x128xf32>
    %cst_37 = arith.constant 0.000000e+00 : f32
    %79 = vector.broadcast %cst_37 : f32 to vector<32x128xf32>
    %80 = arith.maximumf %78, %79 : vector<32x128xf32>
    %c0_38 = arith.constant 0 : index
    %c0_39 = arith.constant 0 : index
    %81 = vector.load %arg6[%c0_38, %c0_39] : memref<32x128xf32, #tpu.memory_space<vmem>>, vector<32x128xf32>
    tpu.vector_store %arg6[%c0_38, %c0_39], %80 {strides = array<i32>} : memref<32x128xf32, #tpu.memory_space<vmem>>, vector<32x128xf32>,
    return
  }
  func.func @transform_0(%arg0: i32) -> (i32, i32) {
    %c0_i32 = arith.constant 0 : i32
    %c0_i32_0 = arith.constant 0 : i32
    return %arg0, %c0_i32 : i32, i32
  }
  func.func @transform_1(%arg0: i32) -> (i32, i32, i32) {
    %c0_i32 = arith.constant 0 : i32
    %c0_i32_0 = arith.constant 0 : i32
    %c0_i32_1 = arith.constant 0 : i32
    %c0_i32_2 = arith.constant 0 : i32
    return %c0_i32, %c0_i32_0, %c0_i32_1 : i32, i32, i32
  }
  func.func @transform_2(%arg0: i32) -> (i32, i32, i32) {
    %c0_i32 = arith.constant 0 : i32
    %c0_i32_0 = arith.constant 0 : i32
    %c0_i32_1 = arith.constant 0 : i32
    %c0_i32_2 = arith.constant 0 : i32
    return %c0_i32, %c0_i32_0, %c0_i32_1 : i32, i32, i32
  }
  func.func @transform_3(%arg0: i32) -> (i32, i32) {
    %c0_i32 = arith.constant 0 : i32
    %c0_i32_0 = arith.constant 0 : i32
    %c0_i32_1 = arith.constant 0 : i32
    return %c0_i32, %c0_i32_0 : i32, i32
  }
  func.func @transform_4(%arg0: i32) -> (i32, i32) {
    %c0_i32 = arith.constant 0 : i32
    %c0_i32_0 = arith.constant 0 : i32
    %c0_i32_1 = arith.constant 0 : i32
    return %c0_i32, %c0_i32_0 : i32, i32
  }
  func.func @transform_5(%arg0: i32) -> (i32, i32) {
    %c0_i32 = arith.constant 0 : i32
    %c0_i32_0 = arith.constant 0 : i32
    return %arg0, %c0_i32 : i32, i32
  }
}

</mosaic_0001>

<bundles_post_ra>
// kernel: tpu_custom_call.1
= control target key start
LH: loop header
LB: loop body
LE: loop exit
PB: predicated region body
PF: predicated region fallthrough
CT: control target
= control target key end

     0   :  { %10 = vsyncpa [#allocation3], 0  ;;  %s1763_s0 = inlined_call_operand.hbm [shape: f32[32,128], index: 0, kind: input, shape index: {}]   ;;  %s1764_s1 = inlined_call_operand.hbm [shape: f32[3,128,128], index: 1, kind: input, shape index: {}]   ;;  %s1765_s2 = inlined_call_operand.hbm [shape: f32[3,128,128], index: 2, kind: input, shape index: {}]   ;;  %s1766_s3 = inlined_call_operand.vmem [shape: f32[1,128], index: 3, kind: input, shape index: {}]   ;;  %s1767_s4 = inlined_call_operand.vmem [shape: f32[1,128], index: 4, kind: input, shape index: {}]   ;;  %s1768_s5 = inlined_call_operand.hbm [shape: f32[32,128], index: 5, kind: output, shape index: {}]  }
   0x1   :  { %11 = vsyncpa [#allocation6], 0 }
   0x2   :  { %12 = vsyncpa [#allocation4], 0  ;;  %s1557_s18 = smov [#allocation5]   ;;  %s1558_s20 = smov [#allocation2]  }
   0x3   :  { %s30_s19 = sshll.u32 %s1557_s18, 4  ;;  %s18_s21 = sshll.u32 %s1558_s20, 4  ;;  %s31_s19 = int_to_ptr.vmem [resolvable:$true] %s30_s19  ;;  %s1593_s21 = int_to_ptr.vmem [resolvable:$true] %s18_s21 }
   0x4   :  { %s1463_s24 = scalar_lea.hbm %s1764_s1, 6144 }
   0x5   :  { %p1464_p0 = scmp.ne.s32.totalorder %s1764_s1, %s1463_s24  ;;  %p1467_p1 = scmp.lt.u32.totalorder %s1463_s24, %s1764_s1 }
   0x7   :  { %p1469_p2 = pnand %p1467_p1, %p1464_p0 }
   0x9   :  { %1472 = shalt.err (!%p1469_p2)
}
   0xa   :  { %s1473_s29 = scalar_lea.vmem %s31_s19, 6144  ;;  %p1478_p4 = scmp.lt.s32.totalorder %s31_s19, %s31_s19 }
   0xb   :  { %p1474_p3 = scmp.ne.s32.totalorder %s31_s19, %s1473_s29  ;;  %p1479_p5 = scmp.lt.s32.totalorder %s1473_s29, %s1473_s29 }
   0xd   :  { %p1480_p6 = por %p1479_p5, %p1478_p4 }
   0xf   :  { %p1481_p7 = pnand %p1480_p6, %p1474_p3 }
  0x11   :  { %1484 = shalt.err (!%p1481_p7)
}
  0x12   :  { %s1559_s30 = smov 128   ;;  %s1560_s6 = smov 8  }
  0x13   :  { %36 = dma.hbm_to_vmem [thread:$0]  %s1764_s1, 6144, %s31_s19, [#allocation6], %s1559_s30, %s1559_s30, %s1560_s6  }
  0x14   :  { %s1485_s11 = scalar_lea.hbm %s1763_s0, 512 }
  0x15   :  { %p1486_p8 = scmp.ne.s32.totalorder %s1763_s0, %s1485_s11  ;;  %p1489_p9 = scmp.lt.u32.totalorder %s1485_s11, %s1763_s0 }
  0x17   :  { %p1491_p10 = pnand %p1489_p9, %p1486_p8 }
  0x19   :  { %1494 = shalt.err (!%p1491_p10)
}
  0x1a   :  { %s1495_s16 = scalar_lea.vmem %s1593_s21, 512  ;;  %p1500_p12 = scmp.lt.s32.totalorder %s1593_s21, %s1593_s21 }
  0x1b   :  { %p1496_p11 = scmp.ne.s32.totalorder %s1593_s21, %s1495_s16  ;;  %p1501_p13 = scmp.lt.s32.totalorder %s1495_s16, %s1495_s16 }
  0x1d   :  { %p1502_p0 = por %p1501_p13, %p1500_p12 }
  0x1f   :  { %p1503_p1 = pnand %p1502_p0, %p1496_p11 }
  0x21   :  { %1506 = shalt.err (!%p1503_p1)
}
  0x22   :  { %24 = dma.hbm_to_vmem [thread:$0]  %s1763_s0, 512, %s1593_s21, [#allocation3], %s1559_s30, %s1559_s30, %s1560_s6  }
  0x23   :  { %s1561_s18 = smov [#allocation7]   ;;  %s1507_s23 = scalar_lea.hbm %s1765_s2, 6144 }
  0x24   :  { %s42_s19 = sshll.u32 %s1561_s18, 4  ;;  %p1508_p2 = scmp.ne.s32.totalorder %s1765_s2, %s1507_s23  ;;  %s43_s19 = int_to_ptr.vmem [resolvable:$true] %s42_s19 }
  0x25   :  { %p1511_p3 = scmp.lt.u32.totalorder %s1507_s23, %s1765_s2 }
  0x27   :  { %p1513_p4 = pnand %p1511_p3, %p1508_p2 }
  0x29   :  { %1516 = shalt.err (!%p1513_p4)
}
  0x2a   :  { %s1517_s28 = scalar_lea.vmem %s43_s19, 6144  ;;  %p1522_p6 = scmp.lt.s32.totalorder %s43_s19, %s43_s19 }
  0x2b   :  { %p1518_p5 = scmp.ne.s32.totalorder %s43_s19, %s1517_s28  ;;  %p1523_p7 = scmp.lt.s32.totalorder %s1517_s28, %s1517_s28 }
  0x2d   :  { %p1524_p8 = por %p1523_p7, %p1522_p6 }
  0x2f   :  { %p1525_p9 = pnand %p1524_p8, %p1518_p5 }
  0x31   :  { %1528 = shalt.err (!%p1525_p9)
}
  0x32   :  { %48 = dma.hbm_to_vmem [thread:$0]  %s1765_s2, 6144, %s43_s19, [#allocation6], %s1559_s30, %s1559_s30, %s1560_s6  }
  0x33   :  { %1551 = dma.done.wait [#allocation3], 512  }
  0x34   :  { %1552 = vsyncadd [#allocation3], 4294966784 }
  0x35   :  { %1553 = dma.done.wait [#allocation6], 12288  }
  0x36   :  { %1554 = vsyncadd [#allocation6], 4294955008  ;;  %v198_v0 = vld [vmem:[#allocation5 + $0x80] sm:$0xff]  ;;  %v199_v1 = vld [vmem:[#allocation5 + $0x88] sm:$0xff]  ;;  %v62_v36 = vlaneseq  ;;  %vm131_vm0 = vcmask 1040384   ;;  %vm144_vm3 = vcmask 1046528  }
  0x37   :  { %v200_v2 = vld [vmem:[#allocation5 + $0x90] sm:$0xff]  ;;  %v1249_v3 = vpack.c.bf16 %v199_v1, %v198_v0  ;;  %v201_v4 = vld [vmem:[#allocation5 + $0x98] sm:$0xff]  ;;  %v202_v6 = vld [vmem:[#allocation5 + $0xa0] sm:$0xff]  ;;  %s1562_s8 = smov [#allocation8]  }
  0x38   :  { %v1253_v5 = vpack.c.bf16 %v201_v4, %v200_v2  ;;  %v203_v7 = vld [vmem:[#allocation5 + $0xa8] sm:$0xff]  ;;  %v1645_v9 = vld [vmem:[#allocation2] sm:$0xff]  ;;  %v204_v10 = vld [vmem:[#allocation5 + $0xb0] sm:$0xff]  ;;  %v1648_v43 = vshrl.u32 %v62_v36, 7  ;;  %s878_s9 = sshll.u32 %s1562_s8, 4  ;;  %s879_s9 = int_to_ptr.vmem [resolvable:$true] %s878_s9 }
  0x39   :  { %1250 = vmatprep.subr.bf16.mxu0 %v1249_v3  ;;  %v1257_v8 = vpack.c.bf16 %v203_v7, %v202_v6  ;;  %v205_v11 = vld [vmem:[#allocation5 + $0xb8] sm:$0xff]  ;;  %1053 = vmatprep.mubr.f32.mxu0 %v1645_v9  ;;  %v206_v13 = vld [vmem:[#allocation5 + $0xc0] sm:$0xff]  ;;  %v207_v14 = vld [vmem:[#allocation5 + $0xc8] sm:$0xff]  ;;  %v132_v53 = vrot.slane %v1645_v9, 7  ;;  %p1534_p11 = scmp.lt.s32.totalorder %s879_s9, %s879_s9 }
  0x3a   :  { %1252 = vmatpush3.bf16.msra.mxu0 %v1249_v3  ;;  %v1261_v12 = vpack.c.bf16 %v205_v11, %v204_v10  ;;  %v1265_v15 = vpack.c.bf16 %v207_v14, %v206_v13  ;;  %v208_v16 = vld [vmem:[#allocation5 + $0xd0] sm:$0xff]  ;;  %v209_v17 = vld [vmem:[#allocation5 + $0xd8] sm:$0xff]  ;;  %v210_v19 = vld [vmem:[#allocation5 + $0xe0] sm:$0xff]  ;;  %v71_v52 = vand.u32 15, %v1648_v43 }
  0x3b   :  { %1254 = vmatprep.subr.bf16.mxu0 %v1253_v5  ;;  %v1269_v18 = vpack.c.bf16 %v209_v17, %v208_v16  ;;  %v558_v20 = vld [vmem:[#allocation7 + $0x80] sm:$0xff]  ;;  %v559_v21 = vld [vmem:[#allocation7 + $0x88] sm:$0xff]  ;;  %v560_v24 = vld [vmem:[#allocation7 + $0x90] sm:$0xff]  ;;  %v143_v62 = vsel %vm131_vm0, 0.0, %v132_v53 }
  0x3c   :  { %v211_v22 = vld [vmem:[#allocation5 + $0xe8] sm:$0xff]  ;;  %v1345_v23 = vpack.c.bf16 %v559_v21, %v558_v20  ;;  %v561_v25 = vld [vmem:[#allocation7 + $0x98] sm:$0xff]  ;;  %v562_v27 = vld [vmem:[#allocation7 + $0xa0] sm:$0xff]  ;;  %vm1660_vm1 = vcmp.ne.s32.totalorder %v71_v52, 0 }
  0x3d   :  { %v1349_v26 = vpack.c.bf16 %v561_v25, %v560_v24  ;;  %v563_v28 = vld [vmem:[#allocation7 + $0xa8] sm:$0xff]  ;;  %v1273_v29 = vpack.c.bf16 %v211_v22, %v210_v19  ;;  %v212_v30 = vld [vmem:[#allocation5 + $0xf0] sm:$0xff]  ;;  %v213_v31 = vld [vmem:[#allocation5 + $0xf8] sm:$0xff] }
  0x3e   :  { %1256 = vmatpush3.bf16.msra.mxu0 %v1253_v5  ;;  %1346 = vmatprep.subr.bf16.mxu1 %v1345_v23  ;;  %v1353_v32 = vpack.c.bf16 %v563_v28, %v562_v27  ;;  %v564_v33 = vld [vmem:[#allocation7 + $0xb0] sm:$0xff]  ;;  %v565_v34 = vld [vmem:[#allocation7 + $0xb8] sm:$0xff]  ;;  %v1277_v35 = vpack.c.bf16 %v213_v31, %v212_v30  ;;  %v181_v37 = vld [vmem:[#allocation5] sm:$0xff]  ;;  %v145_v30 = vrot.slane %v1645_v9, 1 }
  0x3f   :  { %1258 = vmatprep.subr.bf16.mxu0 %v1257_v8  ;;  %1348 = vmatpush3.bf16.msra.mxu1 %v1345_v23  ;;  %v182_v38 = vld [vmem:[#allocation5 + $0x8] sm:$0xff]  ;;  %v1357_v39 = vpack.c.bf16 %v565_v34, %v564_v33  ;;  %v566_v40 = vld [vmem:[#allocation7 + $0xc0] sm:$0xff]  ;;  %v183_v44 = vld [vmem:[#allocation5 + $0x10] sm:$0xff] }
  0x40   :  { %1350 = vmatprep.subr.bf16.mxu1 %v1349_v26  ;;  %v567_v41 = vld [vmem:[#allocation7 + $0xc8] sm:$0xff]  ;;  %v1281_v42 = vpack.c.bf16 %v182_v38, %v181_v37  ;;  %v184_v45 = vld [vmem:[#allocation5 + $0x18] sm:$0xff]  ;;  %v568_v47 = vld [vmem:[#allocation7 + $0xd0] sm:$0xff] }
  0x41   :  { %v1361_v46 = vpack.c.bf16 %v567_v41, %v566_v40  ;;  %v569_v48 = vld [vmem:[#allocation7 + $0xd8] sm:$0xff]  ;;  %v1650_v49 = vld [vmem:[#allocation2 + $0x8] sm:$0xff]  ;;  %v1285_v50 = vpack.c.bf16 %v184_v45, %v183_v44  ;;  %v1652_v51 = vld [vmem:[#allocation2 + $0x10] sm:$0xff] }
  0x42   :  { %1260 = vmatpush3.bf16.msra.mxu0 %v1257_v8  ;;  %v185_v54 = vld [vmem:[#allocation5 + $0x20] sm:$0xff]  ;;  %v186_v55 = vld [vmem:[#allocation5 + $0x28] sm:$0xff]  ;;  %v1365_v56 = vpack.c.bf16 %v569_v48, %v568_v47  ;;  %v1658_v59 = vld [vmem:[#allocation2 + $0x18] sm:$0xff]  ;;  %v133_v19 = vrot.slane %v1650_v49, 7  ;;  %v135_v21 = vrot.slane %v1652_v51, 7  ;;  %v146_v31 = vrot.slane %v1650_v49, 1 }
  0x43   :  { %1262 = vmatprep.subr.bf16.mxu0 %v1261_v12  ;;  %1352 = vmatpush3.bf16.msra.mxu1 %v1349_v26  ;;  %v570_v57 = vld [vmem:[#allocation7 + $0xe0] sm:$0xff]  ;;  %v571_v58 = vld [vmem:[#allocation7 + $0xe8] sm:$0xff]  ;;  %v1289_v60 = vpack.c.bf16 %v186_v55, %v185_v54  ;;  %v187_v63 = vld [vmem:[#allocation5 + $0x30] sm:$0xff]  ;;  %v137_v27 = vrot.slane %v1658_v59, 7  ;;  %v64_v54 = vadd.s32 8, %v1648_v43 }
  0x44   :  { %1354 = vmatprep.subr.bf16.mxu1 %v1353_v32  ;;  %v188_v0 = vld [vmem:[#allocation5 + $0x38] sm:$0xff]  ;;  %v1369_v1 = vpack.c.bf16 %v571_v58, %v570_v57  ;;  %v189_v3 = vld [vmem:[#allocation5 + $0x40] sm:$0xff]  ;;  %v190_v4 = vld [vmem:[#allocation5 + $0x48] sm:$0xff]  ;;  %v134_v25 = vsel %vm131_vm0, %v132_v53, %v133_v19  ;;  %v147_v36 = vsel %vm144_vm3, %v145_v30, %v146_v31  ;;  %v66_v58 = vadd.s32 24, %v1648_v43 }
  0x45   :  { %v1293_v2 = vpack.c.bf16 %v188_v0, %v187_v63  ;;  %v1297_v5 = vpack.c.bf16 %v190_v4, %v189_v3  ;;  %v191_v6 = vld [vmem:[#allocation5 + $0x50] sm:$0xff]  ;;  %v192_v7 = vld [vmem:[#allocation5 + $0x58] sm:$0xff]  ;;  %v193_v10 = vld [vmem:[#allocation5 + $0x60] sm:$0xff]  ;;  %v138_v34 = vsel %vm131_vm0, %v135_v21, %v137_v27  ;;  %v78_v57 = vand.u32 15, %v64_v54 }
  0x46   :  { %1264 = vmatpush3.bf16.msra.mxu0 %v1261_v12  ;;  %v1301_v8 = vpack.c.bf16 %v192_v7, %v191_v6  ;;  %v194_v11 = vld [vmem:[#allocation5 + $0x68] sm:$0xff]  ;;  %v195_v13 = vld [vmem:[#allocation5 + $0x70] sm:$0xff]  ;;  %v196_v14 = vld [vmem:[#allocation5 + $0x78] sm:$0xff]  ;;  %v92_v0 = vand.u32 15, %v66_v58 }
  0x47   :  { %1266 = vmatprep.subr.bf16.mxu0 %v1265_v15  ;;  %1356 = vmatpush3.bf16.msra.mxu1 %v1353_v32  ;;  %v1305_v12 = vpack.c.bf16 %v194_v11, %v193_v10  ;;  %v1309_v16 = vpack.c.bf16 %v196_v14, %v195_v13  ;;  %v385_v17 = vld [vmem:[#allocation5 + $0x100] sm:$0xff]  ;;  %v387_v23 = vld [vmem:[#allocation5 + $0x110] sm:$0xff]  ;;  %v388_v24 = vld [vmem:[#allocation5 + $0x118] sm:$0xff]  ;;  %vm1692_vm4 = vcmp.ne.s32.totalorder %v78_v57, 15 }
  0x48   :  { %1358 = vmatprep.subr.bf16.mxu1 %v1357_v39  ;;  %v1317_v28 = vpack.c.bf16 %v388_v24, %v387_v23  ;;  %v389_v32 = vld [vmem:[#allocation5 + $0x120] sm:$0xff]  ;;  %v390_v33 = vld [vmem:[#allocation5 + $0x128] sm:$0xff]  ;;  %v391_v37 = vld [vmem:[#allocation5 + $0x130] sm:$0xff]  ;;  %vm1700_vm5 = vcmp.ne.s32.totalorder %v92_v0, 15 }
  0x49   :  { %v392_v38 = vld [vmem:[#allocation5 + $0x138] sm:$0xff]  ;;  %v393_v40 = vld [vmem:[#allocation5 + $0x140] sm:$0xff]  ;;  %v394_v41 = vld [vmem:[#allocation5 + $0x148] sm:$0xff] }
  0x4a   :  { %1268 = vmatpush3.bf16.msra.mxu0 %v1265_v15  ;;  %v65_v15 = vadd.s32 16, %v1648_v43  ;;  %v395_v44 = vld [vmem:[#allocation5 + $0x150] sm:$0xff]  ;;  %v396_v45 = vld [vmem:[#allocation5 + $0x158] sm:$0xff]  ;;  %v397_v47 = vld [vmem:[#allocation5 + $0x160] sm:$0xff] }
  0x4b   :  { %1270 = vmatprep.subr.bf16.mxu0 %v1269_v18  ;;  %1360 = vmatpush3.bf16.msra.mxu1 %v1357_v39  ;;  %v1325_v39 = vpack.c.bf16 %v392_v38, %v391_v37  ;;  %v398_v48 = vld [vmem:[#allocation5 + $0x168] sm:$0xff]  ;;  %v399_v52 = vld [vmem:[#allocation5 + $0x170] sm:$0xff]  ;;  %v400_v53 = vld [vmem:[#allocation5 + $0x178] sm:$0xff] }
  0x4c   :  { %1362 = vmatprep.subr.bf16.mxu1 %v1361_v46  ;;  %v85_v20 = vand.u32 15, %v65_v15  ;;  %v1341_v55 = vpack.c.bf16 %v400_v53, %v399_v52  ;;  %v572_v3 = vld [vmem:[#allocation7 + $0xf0] sm:$0xff]  ;;  %v573_v4 = vld [vmem:[#allocation7 + $0xf8] sm:$0xff]  ;;  %v541_v6 = vld [vmem:[#allocation7] sm:$0xff] }
  0x4d   :  { %v542_v7 = vld [vmem:[#allocation7 + $0x8] sm:$0xff]  ;;  %v895_v10 = vld [vmem:[%s1766_s3] ss:$0 sm:$0xff]  ;;  %v543_v15 = vld [vmem:[#allocation7 + $0x10] sm:$0xff] }
  0x4e   :  { %1272 = vmatpush3.bf16.msra.mxu0 %v1269_v18  ;;  %v386_v18 = vld [vmem:[#allocation5 + $0x108] sm:$0xff]  ;;  %vm1676_vm2 = vcmp.ne.s32.totalorder %v85_v20, 0  ;;  %v551_v53 = vld [vmem:[#allocation7 + $0x50] sm:$0xff]  ;;  %v552_v54 = vld [vmem:[#allocation7 + $0x58] sm:$0xff] }
  0x4f   :  { %1274 = vmatprep.subr.bf16.mxu0 %v1273_v29  ;;  %1364 = vmatpush3.bf16.msra.mxu1 %v1361_v46  ;;  %v1313_v22 = vpack.c.bf16 %v386_v18, %v385_v17  ;;  %v1333_v46 = vpack.c.bf16 %v396_v45, %v395_v44  ;;  %v546_v30 = vld [vmem:[#allocation7 + $0x28] sm:$0xff] }
  0x50   :  { %1366 = vmatprep.subr.bf16.mxu1 %v1365_v56  ;;  %v550_v52 = vld [vmem:[#allocation7 + $0x48] sm:$0xff] }
  0x51   :  { %v554_v57 = vld [vmem:[#allocation7 + $0x68] sm:$0xff] }
  0x52   :  { %1276 = vmatpush3.bf16.msra.mxu0 %v1273_v29  ;;  %v136_v29 = vsel %vm131_vm0, %v133_v19, %v135_v21 }
  0x53   :  { %1278 = vmatprep.subr.bf16.mxu0 %v1277_v35  ;;  %1368 = vmatpush3.bf16.msra.mxu1 %v1365_v56  ;;  %v148_v56 = vrot.slane %v1652_v51, 1 }
  0x54   :  { %1370 = vmatprep.subr.bf16.mxu1 %v1369_v1 }
  0x55   :  { %v149_v63 = vsel %vm144_vm3, %v146_v31, %v148_v56 }
  0x56   :  { %1280 = vmatpush3.bf16.msra.mxu0 %v1277_v35  ;;  %v1321_v35 = vpack.c.bf16 %v390_v33, %v389_v32 }
  0x57   :  { %1282 = vmatprep.subr.bf16.mxu0 %v1281_v42  ;;  %1372 = vmatpush3.bf16.msra.mxu1 %v1369_v1 }
  0x59   :  { %1054 = vmatmul.mubr.f32.vlgmr.msra.gmra.mrb[0].mxu0 %v1650_v49 }
  0x5a   :  { %1284 = vmatpush3.bf16.msra.mxu0 %v1281_v42  ;;  %1056 = vmatprep.mubr.f32.mxu0 %v1652_v51  ;;  %v1329_v42 = vpack.c.bf16 %v394_v41, %v393_v40  ;;  %v547_v40 = vld [vmem:[#allocation7 + $0x30] sm:$0xff]  ;;  %v548_v41 = vld [vmem:[#allocation7 + $0x38] sm:$0xff] }
  0x5b   :  { %1286 = vmatprep.subr.bf16.mxu0 %v1285_v50 }
  0x5d   :  { %1057 = vmatmul.mubr.f32.gmra.mrb[2].mxu0 %v1658_v59 }
  0x5e   :  { %1288 = vmatpush3.bf16.msra.mxu0 %v1285_v50  ;;  %1091 = vmatprep.mubr.msk.f32.mxu0 %vm1660_vm1, %v143_v62  ;;  %v1337_v50 = vpack.c.bf16 %v398_v48, %v397_v47  ;;  %v1389_v47 = vpack.c.bf16 %v548_v41, %v547_v40 }
  0x5f   :  { %1290 = vmatprep.subr.bf16.mxu0 %v1289_v60 }
  0x62   :  { %1292 = vmatpush3.bf16.msra.mxu0 %v1289_v60  ;;  %v150_v60 = vrot.slane %v1658_v59, 1 }
  0x63   :  { %1294 = vmatprep.subr.bf16.mxu0 %v1293_v2 }
  0x64   :  { %v151_v1 = vsel %vm144_vm3, %v148_v56, %v150_v60  ;;  %v156_v43 = vsel %vm144_vm3, %v150_v60, 0.0  ;;  %v553_v56 = vld [vmem:[#allocation7 + $0x60] sm:$0xff]  ;;  %v555_v60 = vld [vmem:[#allocation7 + $0x70] sm:$0xff] }
  0x65   :  { %v1401_v58 = vpack.c.bf16 %v554_v57, %v553_v56 }
  0x66   :  { %1296 = vmatpush3.bf16.msra.mxu0 %v1293_v2 }
  0x67   :  { %1298 = vmatprep.subr.bf16.mxu0 %v1297_v5 }
  0x6a   :  { %1300 = vmatpush3.bf16.msra.mxu0 %v1297_v5  ;;  %v1373_v5 = vpack.c.bf16 %v573_v4, %v572_v3  ;;  %v747_v4 = vld [vmem:[#allocation7 + $0x110] sm:$0xff] }
  0x6b   :  { %1302 = vmatprep.subr.bf16.mxu0 %v1301_v8 }
  0x6c   :  { %1374 = vmatprep.subr.bf16.mxu1 %v1373_v5 }
  0x6d   :  { %1376 = vmatpush3.bf16.msra.mxu1 %v1373_v5  ;;  %v748_v5 = vld [vmem:[#allocation7 + $0x118] sm:$0xff] }
  0x6e   :  { %1304 = vmatpush3.bf16.msra.mxu0 %v1301_v8  ;;  %v1377_v8 = vpack.c.bf16 %v542_v7, %v541_v6  ;;  %v1413_v6 = vpack.c.bf16 %v748_v5, %v747_v4  ;;  %v749_v7 = vld [vmem:[#allocation7 + $0x120] sm:$0xff] }
  0x6f   :  { %1306 = vmatprep.subr.bf16.mxu0 %v1305_v12 }
  0x70   :  { %1378 = vmatprep.subr.bf16.mxu1 %v1377_v8 }
  0x72   :  { %1308 = vmatpush3.bf16.msra.mxu0 %v1305_v12 }
  0x73   :  { %1310 = vmatprep.subr.bf16.mxu0 %v1309_v16 }
  0x76   :  { %1312 = vmatpush3.bf16.msra.mxu0 %v1309_v16  ;;  %v544_v16 = vld [vmem:[#allocation7 + $0x18] sm:$0xff] }
  0x77   :  { %1314 = vmatprep.subr.bf16.mxu0 %v1313_v22  ;;  %v1381_v24 = vpack.c.bf16 %v544_v16, %v543_v15  ;;  %v754_v15 = vld [vmem:[#allocation7 + $0x148] sm:$0xff] }
  0x79   :  { %1092 = vmatmul.mubr.f32.vlgmr.msra.gmra.mrb[0].mxu0 %v134_v25 }
  0x7a   :  { %1316 = vmatpush3.bf16.msra.mxu0 %v1313_v22  ;;  %1094 = vmatprep.mubr.msk.f32.mxu0 %vm1676_vm2, %v136_v29  ;;  %v545_v29 = vld [vmem:[#allocation7 + $0x20] sm:$0xff] }
  0x7b   :  { %1318 = vmatprep.subr.bf16.mxu0 %v1317_v28  ;;  %v1385_v37 = vpack.c.bf16 %v546_v30, %v545_v29 }
  0x7d   :  { %1095 = vmatmul.mubr.f32.gmra.mrb[2].mxu0 %v138_v34 }
  0x7e   :  { %1320 = vmatpush3.bf16.msra.mxu0 %v1317_v28  ;;  %1129 = vmatprep.mubr.f32.mxu0 %v147_v36 }
  0x7f   :  { %1322 = vmatprep.subr.bf16.mxu0 %v1321_v35 }
  0x82   :  { %1324 = vmatpush3.bf16.msra.mxu0 %v1321_v35 }
  0x83   :  { %1326 = vmatprep.subr.bf16.mxu0 %v1325_v39 }
  0x86   :  { %1328 = vmatpush3.bf16.msra.mxu0 %v1325_v39 }
  0x87   :  { %1330 = vmatprep.subr.bf16.mxu0 %v1329_v42 }
  0x8a   :  { %1332 = vmatpush3.bf16.msra.mxu0 %v1329_v42 }
  0x8b   :  { %1334 = vmatprep.subr.bf16.mxu0 %v1333_v46 }
  0x8e   :  { %1336 = vmatpush3.bf16.msra.mxu0 %v1333_v46 }
  0x8f   :  { %1338 = vmatprep.subr.bf16.mxu0 %v1337_v50 }
  0x92   :  { %1340 = vmatpush3.bf16.msra.mxu0 %v1337_v50  ;;  %v549_v50 = vld [vmem:[#allocation7 + $0x40] sm:$0xff] }
  0x93   :  { %1342 = vmatprep.subr.bf16.mxu0 %v1341_v55  ;;  %v1393_v61 = vpack.c.bf16 %v550_v52, %v549_v50 }
  0x96   :  { %1344 = vmatpush3.bf16.msra.mxu0 %v1341_v55  ;;  %v1397_v55 = vpack.c.bf16 %v552_v54, %v551_v53 }
  0x99   :  { %1130 = vmatmul.mubr.msk.f32.vlgmr.msra.gmra.mrb[0].mxu0 %vm1692_vm4, %v149_v63  ;;  %v556_v63 = vld [vmem:[#allocation7 + $0x78] sm:$0xff] }
  0x9a   :  { %1132 = vmatprep.mubr.f32.mxu0 %v151_v1  ;;  %v1405_v0 = vpack.c.bf16 %v556_v63, %v555_v60  ;;  %v745_v1 = vld [vmem:[#allocation7 + $0x100] sm:$0xff] }
  0x9d   :  { %1133 = vmatmul.mubr.msk.f32.gmra.mrb[2].mxu0 %vm1700_vm5, %v156_v43  ;;  %v746_v43 = vld [vmem:[#allocation7 + $0x108] sm:$0xff] }
  0x9e   :  { %v1409_v3 = vpack.c.bf16 %v746_v43, %v745_v1 }
 0x16c   :  { %v1131_v11 = vpop.f32.mrb[0].mxu0 }
 0x16d   :  { %v498_v12 = vadd.f32 %v1131_v11, %v895_v10  ;;  %v467_v13 = vpop.f32.mrb[1].mxu0  ;;  %v751_v11 = vld [vmem:[#allocation7 + $0x130] sm:$0xff] }
 0x16e   :  { %v497_v14 = vadd.f32 %v895_v10, %v467_v13 }
 0x16f   :  { %v502_v17 = vmax.f32 %v498_v12, 0.0  ;;  %v752_v12 = vld [vmem:[#allocation7 + $0x138] sm:$0xff] }
 0x170   :  { %v501_v18 = vmax.f32 %v497_v14, 0.0  ;;  %v1134_v19 = vpop.f32.mrb[2].mxu0  ;;  %v1421_v13 = vpack.c.bf16 %v752_v12, %v751_v11  ;;  %v753_v14 = vld [vmem:[#allocation7 + $0x140] sm:$0xff] }
 0x171   :  { %v510_v20 = vrot.slane %v502_v17, 7  ;;  %v522_v21 = vrot.slane %v502_v17, 1  ;;  %v500_v22 = vadd.f32 %v1134_v19, %v895_v10  ;;  %v477_v23 = vpop.f32.mrb[3].mxu0  ;;  %v1425_v16 = vpack.c.bf16 %v754_v15, %v753_v14  ;;  %v757_v19 = vld [vmem:[#allocation7 + $0x160] sm:$0xff] }
 0x172   :  { %v521_v25 = vrot.slane %v501_v18, 1  ;;  %v499_v27 = vadd.f32 %v895_v10, %v477_v23  ;;  %1167 = vmatprep.mubr.f32.mxu1 %v501_v18  ;;  %v509_v28 = vrot.slane %v501_v18, 7  ;;  %v756_v18 = vld [vmem:[#allocation7 + $0x158] sm:$0xff] }
 0x173   :  { %v1710_v31 = vmax.f32 %v500_v22, 0.0  ;;  %1168 = vmatmul.mubr.f32.vlgmr.msra.gmra.mrb[0].mxu1 %v502_v17  ;;  %v755_v17 = vld [vmem:[#allocation7 + $0x150] sm:$0xff]  ;;  %v760_v23 = vld [vmem:[#allocation7 + $0x178] sm:$0xff] }
 0x174   :  { %v503_v32 = vmax.f32 %v499_v27, 0.0  ;;  %1380 = vmatpush3.bf16.msra.mxu1 %v1377_v8  ;;  %v511_v33 = vsel %vm131_vm0, %v509_v28, %v510_v20  ;;  %v523_v34 = vsel %vm144_vm3, %v521_v25, %v522_v21  ;;  %v520_v42 = vsel %vm131_vm0, 0.0, %v509_v28  ;;  %v750_v8 = vld [vmem:[#allocation7 + $0x128] sm:$0xff]  ;;  %v759_v22 = vld [vmem:[#allocation7 + $0x170] sm:$0xff]  ;;  %v900_v27 = vld [vmem:[%s1767_s4] ss:$0 sm:$0xff] }
 0x175   :  { %v514_v35 = vrot.slane %v1710_v31, 7  ;;  %v526_v36 = vrot.slane %v1710_v31, 1  ;;  %1382 = vmatprep.subr.bf16.mxu1 %v1381_v24  ;;  %v1417_v10 = vpack.c.bf16 %v750_v8, %v749_v7  ;;  %v1429_v26 = vpack.c.bf16 %v756_v18, %v755_v17  ;;  %s1529_s4 = scalar_lea.vmem %s879_s9, 512 }
 0x176   :  { %v512_v38 = vrot.slane %v503_v32, 7  ;;  %v524_v39 = vrot.slane %v503_v32, 1  ;;  %1170 = vmatprep.mubr.f32.mxu1 %v503_v32  ;;  %p1530_p10 = scmp.ne.s32.totalorder %s879_s9, %s1529_s4  ;;  %p1535_p12 = scmp.lt.s32.totalorder %s1529_s4, %s1529_s4 }
 0x177   :  { %1171 = vmatmul.mubr.f32.gmra.mrb[2].mxu1 %v1710_v31  ;;  %v532_v25 = vsel %vm144_vm3, %v526_v36, 0.0 }
 0x178   :  { %1384 = vmatpush3.bf16.msra.mxu1 %v1381_v24  ;;  %1205 = vmatprep.mubr.msk.f32.mxu1 %vm1660_vm1, %v520_v42  ;;  %v513_v44 = vsel %vm131_vm0, %v510_v20, %v512_v38  ;;  %v515_v45 = vsel %vm131_vm0, %v512_v38, %v514_v35  ;;  %v1723_v46 = vsel %vm144_vm3, %v522_v21, %v524_v39  ;;  %v758_v20 = vld [vmem:[#allocation7 + $0x168] sm:$0xff]  ;;  %p1536_p13 = por %p1535_p12, %p1534_p11 }
 0x179   :  { %1386 = vmatprep.subr.bf16.mxu1 %v1385_v37  ;;  %v1728_v48 = vsel %vm144_vm3, %v524_v39, %v526_v36  ;;  %v1433_v21 = vpack.c.bf16 %v758_v20, %v757_v19  ;;  %v1437_v24 = vpack.c.bf16 %v760_v23, %v759_v22 }
 0x17a   :  { %p1537_p0 = pnand %p1536_p13, %p1530_p10 }
 0x17c   :  { %1388 = vmatpush3.bf16.msra.mxu1 %v1385_v37 }
 0x17d   :  { %1390 = vmatprep.subr.bf16.mxu1 %v1389_v47 }
 0x180   :  { %1392 = vmatpush3.bf16.msra.mxu1 %v1389_v47 }
 0x181   :  { %1394 = vmatprep.subr.bf16.mxu1 %v1393_v61 }
 0x184   :  { %1396 = vmatpush3.bf16.msra.mxu1 %v1393_v61 }
 0x185   :  { %1398 = vmatprep.subr.bf16.mxu1 %v1397_v55 }
 0x188   :  { %1400 = vmatpush3.bf16.msra.mxu1 %v1397_v55 }
 0x189   :  { %1402 = vmatprep.subr.bf16.mxu1 %v1401_v58 }
 0x18c   :  { %1404 = vmatpush3.bf16.msra.mxu1 %v1401_v58 }
 0x18d   :  { %1406 = vmatprep.subr.bf16.mxu1 %v1405_v0 }
 0x190   :  { %1408 = vmatpush3.bf16.msra.mxu1 %v1405_v0 }
 0x191   :  { %1410 = vmatprep.subr.bf16.mxu1 %v1409_v3 }
 0x193   :  { %1206 = vmatmul.mubr.f32.vlgmr.msra.gmra.mrb[0].mxu1 %v511_v33 }
 0x194   :  { %1208 = vmatprep.mubr.msk.f32.mxu1 %vm1676_vm2, %v513_v44  ;;  %1412 = vmatpush3.bf16.msra.mxu1 %v1409_v3 }
 0x195   :  { %1414 = vmatprep.subr.bf16.mxu1 %v1413_v6 }
 0x197   :  { %1209 = vmatmul.mubr.f32.gmra.mrb[2].mxu1 %v515_v45 }
 0x198   :  { %1416 = vmatpush3.bf16.msra.mxu1 %v1413_v6  ;;  %1243 = vmatprep.mubr.f32.mxu1 %v523_v34 }
 0x199   :  { %1418 = vmatprep.subr.bf16.mxu1 %v1417_v10 }
 0x19c   :  { %1420 = vmatpush3.bf16.msra.mxu1 %v1417_v10 }
 0x19d   :  { %1422 = vmatprep.subr.bf16.mxu1 %v1421_v13 }
 0x1a0   :  { %1424 = vmatpush3.bf16.msra.mxu1 %v1421_v13 }
 0x1a1   :  { %1426 = vmatprep.subr.bf16.mxu1 %v1425_v16 }
 0x1a4   :  { %1428 = vmatpush3.bf16.msra.mxu1 %v1425_v16 }
 0x1a5   :  { %1430 = vmatprep.subr.bf16.mxu1 %v1429_v26 }
 0x1a8   :  { %1432 = vmatpush3.bf16.msra.mxu1 %v1429_v26 }
 0x1a9   :  { %1434 = vmatprep.subr.bf16.mxu1 %v1433_v21 }
 0x1ac   :  { %1436 = vmatpush3.bf16.msra.mxu1 %v1433_v21 }
 0x1ad   :  { %1438 = vmatprep.subr.bf16.mxu1 %v1437_v24 }
 0x1b0   :  { %1440 = vmatpush3.bf16.msra.mxu1 %v1437_v24 }
 0x1b3   :  { %1244 = vmatmul.mubr.msk.f32.vlgmr.msra.gmra.mrb[0].mxu1 %vm1692_vm4, %v1723_v46 }
 0x1b4   :  { %1246 = vmatprep.mubr.f32.mxu1 %v1728_v48 }
 0x1b7   :  { %1247 = vmatmul.mubr.msk.f32.gmra.mrb[2].mxu1 %vm1700_vm5, %v532_v25 }
 0x286   :  { %v1245_v28 = vpop.f32.mrb[0].mxu1 }
 0x287   :  { %v858_v29 = vadd.f32 %v1245_v28, %v900_v27  ;;  %v827_v30 = vpop.f32.mrb[1].mxu1 }
 0x288   :  { %v857_v32 = vadd.f32 %v900_v27, %v827_v30 }
 0x289   :  { %v862_v62 = vadd.f32 %v858_v29, %v1650_v49 }
 0x28a   :  { %v861_v33 = vadd.f32 %v857_v32, %v1645_v9  ;;  %v1248_v34 = vpop.f32.mrb[2].mxu1 }
 0x28b   :  { %v866_v35 = vmax.f32 %v862_v62, 0.0  ;;  %v860_v31 = vadd.f32 %v1248_v34, %v900_v27  ;;  %v837_v37 = vpop.f32.mrb[3].mxu1 }
 0x28c   :  { %v865_v36 = vmax.f32 %v861_v33, 0.0  ;;  %v859_v38 = vadd.f32 %v900_v27, %v837_v37 }
 0x28d   :  { %870 = vst [vmem:[#allocation8 + $0x8] sm:$0xff] %v866_v35  ;;  %v864_v2 = vadd.f32 %v860_v31, %v1658_v59 }
 0x28e   :  { %869 = vst [vmem:[#allocation8] sm:$0xff] %v865_v36  ;;  %v863_v39 = vadd.f32 %v859_v38, %v1652_v51 }
 0x28f   :  { %v868_v40 = vmax.f32 %v864_v2, 0.0 }
 0x290   :  { %v867_v41 = vmax.f32 %v863_v39, 0.0 }
 0x291   :  { %872 = vst [vmem:[#allocation8 + $0x18] sm:$0xff] %v868_v40 }
 0x292   :  { %871 = vst [vmem:[#allocation8 + $0x10] sm:$0xff] %v867_v41 }
 0x293   :  { %1540 = shalt.err (!%p1537_p0)
}
 0x294   :  { %s1541_s12 = scalar_lea.hbm %s1768_s5, 512 }
 0x295   :  { %p1542_p1 = scmp.ne.s32.totalorder %s1768_s5, %s1541_s12  ;;  %p1545_p2 = scmp.lt.u32.totalorder %s1541_s12, %s1768_s5 }
 0x297   :  { %p1547_p3 = pnand %p1545_p2, %p1542_p1 }
 0x299   :  { %1550 = shalt.err (!%p1547_p3)
}
 0x29a   :  { %884 = dma.vmem_to_hbm [thread:$0]  %s879_s9, 512, %s1768_s5, [#allocation4], %s1559_s30, %s1559_s30, %s1560_s6  }
 0x29b   :  { %1555 = dma.done.wait [#allocation4], 512  }
 0x29c   :  { %1556 = vsyncadd [#allocation4], 4294966784 }
 0x29d   :  { %888 = vsyncpa [#allocation3], 1 }
 0x29e   :  { %889 = vsyncpa [#allocation6], 1 }
 0x29f   :  { %890 = vsyncpa [#allocation4], 1 }

</bundles_post_ra>
